<compile_context>
chip_gen: v7x
topology: tpu7x:2x2x1
jax: 0.10.0
libtpu: 0.0.40
codegen_flags: <defaults>
</compile_context>

<pallas_src>
import jax
import jax.numpy as jnp
from jax.experimental import pallas as pl
from jax.experimental.pallas import tpu as pltpu


def _one_hot_kernel(x_ref, o_ref):
    # x_ref: (Rt, 1) int32 indices for this row tile
    # o_ref: (Rt, Ct) one-hot output tile (class axis on lanes)
    rt, ct = o_ref.shape
    x = x_ref[...]                                            # (Rt, 1)
    col0 = pl.program_id(1) * ct                              # class offset of this tile
    classes = jax.lax.broadcasted_iota(jnp.int32, (rt, ct), 1) + col0
    o_ref[...] = (x == classes).astype(o_ref.dtype)


def _round_up(v, m):
    return ((v + m - 1) // m) * m


def one_hot_embedding(x, num_classes, dtype=jnp.float32,
                      *, row_tile=1024, class_tile=2048):
    """One-hot embed integer tensor `x` (any shape) -> x.shape + (num_classes,).

    Out-of-range indices (x < 0 or x >= num_classes) produce an all-zero row
    (torch.nn.functional.one_hot would raise instead).
    """
    orig_shape = x.shape
    x_flat = x.reshape(-1).astype(jnp.int32)
    R = x_flat.shape[0]

    # Row (sublane) tiling: multiple of 8, capped at row_tile.
    Rt = _round_up(min(row_tile, _round_up(max(R, 1), 8)), 8)
    R_pad = _round_up(max(R, 1), Rt)

    # Class (lane) tiling: multiple of 128, capped at class_tile.
    Ct = _round_up(min(class_tile, _round_up(num_classes, 128)), 128)
    C_pad = _round_up(num_classes, Ct)

    # Pad rows with -1 (never matches a class id >= 0); padded rows/classes are
    # sliced off below.
    x_pad = jnp.pad(x_flat.reshape(R, 1), ((0, R_pad - R), (0, 0)),
                    constant_values=-1)

    grid = (R_pad // Rt, C_pad // Ct)

    out = pl.pallas_call(
        _one_hot_kernel,
        out_shape=jax.ShapeDtypeStruct((R_pad, C_pad), dtype),
        grid_spec=pltpu.PrefetchScalarGridSpec(
            num_scalar_prefetch=0,
            grid=grid,
            in_specs=[pl.BlockSpec((Rt, 1), lambda r, c: (r, 0))],
            out_specs=pl.BlockSpec((Rt, Ct), lambda r, c: (r, c)),
        ),
        compiler_params=pltpu.CompilerParams(
            dimension_semantics=("parallel", "parallel"),
            vmem_limit_bytes=32 * 1024 * 1024,
        ),
    )(x_pad)

    out = out[:R, :num_classes]
    return out.reshape(orig_shape + (num_classes,))


if __name__ == "__main__":
    key = jax.random.PRNGKey(0)
    B, S = 2, 8
    num_classes = 32

    x = jax.random.randint(key, (B, S), 0, num_classes, dtype=jnp.int32)

    out = one_hot_embedding(x, num_classes)
    out = jax.block_until_ready(out)

    # Sanity check against pure-JAX reference.
    ref = jax.nn.one_hot(x, num_classes, dtype=jnp.float32)
    assert out.shape == (B, S, num_classes)
    assert out.dtype == jnp.float32
    assert jnp.array_equal(out, ref)

    # Also exercise a larger, non-aligned shape to hit padding paths.
    x2 = jax.random.randint(jax.random.PRNGKey(1), (3, 17), 0, 200, dtype=jnp.int32)
    out2 = jax.block_until_ready(one_hot_embedding(x2, 200, dtype=jnp.bfloat16))
    ref2 = jax.nn.one_hot(x2, 200, dtype=jnp.bfloat16)
    assert out2.shape == (3, 17, 200)
    assert jnp.array_equal(out2.astype(jnp.float32), ref2.astype(jnp.float32))

    print("KERNEL_OK")
</pallas_src>

<mosaic_0001>
module attributes {stable_mosaic.version = 11 : i64} {
  func.func @_one_hot_kernel(%arg0: i32, %arg1: i32, %arg2: memref<16x1xi32, #tpu.memory_space<vmem>>, %arg3: memref<16x128xf32, #tpu.memory_space<vmem>>) attributes {dimension_semantics = [#tpu.dimension_semantics<parallel>, #tpu.dimension_semantics<parallel>], iteration_bounds = array<i64: 1, 1>, scalar_prefetch = 0 : i64, scratch_operands = 0 : i64, tpu.core_type = #tpu.core_type<tc>, window_params = [{transform_indices = @transform_0, window_bounds = array<i64: 16, 1>}, {transform_indices = @transform_1, window_bounds = array<i64: 16, 128>}]} {
    %c0 = arith.constant 0 : index
    %c0_0 = arith.constant 0 : index
    %0 = vector.load %arg2[%c0, %c0_0] : memref<16x1xi32, #tpu.memory_space<vmem>>, vector<16x1xi32>
    %c128_i32 = arith.constant 128 : i32
    %1 = arith.muli %arg1, %c128_i32 : i32
    %2 = tpu.iota {dimensions = array<i32: 1>} : vector<16x128xi32>
    %3 = vector.broadcast %1 : i32 to vector<16x128xi32>
    %4 = arith.addi %2, %3 : vector<16x128xi32>
    %5 = vector.broadcast %0 : vector<16x1xi32> to vector<16x128xi32>
    %6 = arith.cmpi eq, %5, %4 : vector<16x128xi32>
    %7 = arith.extui %6 : vector<16x128xi1> to vector<16x128xi32>
    %8 = arith.sitofp %7 : vector<16x128xi32> to vector<16x128xf32>
    %c0_1 = arith.constant 0 : index
    %c0_2 = arith.constant 0 : index
    %9 = vector.load %arg3[%c0_1, %c0_2] : memref<16x128xf32, #tpu.memory_space<vmem>>, vector<16x128xf32>
    tpu.vector_store %arg3[%c0_1, %c0_2], %8 {strides = array<i32>} : memref<16x128xf32, #tpu.memory_space<vmem>>, vector<16x128xf32>,
    return
  }
  func.func @transform_0(%arg0: i32, %arg1: i32) -> (i32, i32) {
    %c0_i32 = arith.constant 0 : i32
    %c0_i32_0 = arith.constant 0 : i32
    return %arg0, %c0_i32 : i32, i32
  }
  func.func @transform_1(%arg0: i32, %arg1: i32) -> (i32, i32) {
    %c0_i32 = arith.constant 0 : i32
    return %arg0, %arg1 : i32, i32
  }
}

</mosaic_0001>

<bundles_post_ra>
// kernel: tpu_custom_call.1
= control target key start
LH: loop header
LB: loop body
LE: loop exit
PB: predicated region body
PF: predicated region fallthrough
CT: control target
= control target key end

     0   :  { %s111_s0 = inlined_call_operand.vmem [shape: s32[16,1], index: 0, kind: input, shape index: {}]   ;;  %s112_s1 = inlined_call_operand.hbm [shape: f32[16,128], index: 1, kind: output, shape index: {}]  }
   0x1   :  { %v9_v0 = vld [vmem:[%s111_s0] sm:$0xff] }
   0x2   :  { %6 = vsyncpa [#allocation3], 0  ;;  %v78_v1 = vmov 0   ;;  %v10_v2 = vld [vmem:[%s111_s0 + $0x8] sm:$0xff]  ;;  %v12_v3 = vlaneseq  ;;  %s79_s10 = smov [#allocation2]   ;;  %v80_v6 = vmov 0.0  }
   0x3   :  { %53 = vset.pattern.permute.xlu0 %v78_v1  ;;  %s35_s11 = sshll.u32 %s79_s10, 4  ;;  %s36_s11 = int_to_ptr.vmem [resolvable:$true] %s35_s11 }
   0x4   :  { %17 = vperm.xlu0 %53, %v9_v0   ;;  %v13_v4 = vand.u32 127, %v12_v3  ;;  %s54_s12 = scalar_lea.vmem %s36_s11, 256  ;;  %p59_p1 = scmp.lt.s32.totalorder %s36_s11, %s36_s11 }
   0x5   :  { %p55_p0 = scmp.ne.s32.totalorder %s36_s11, %s54_s12  ;;  %p60_p2 = scmp.lt.s32.totalorder %s54_s12, %s54_s12 }
   0x7   :  { %p61_p3 = por %p60_p2, %p59_p1 }
   0x8   :  { %20 = vperm.xlu0 %53, %v10_v2  }
   0x9   :  { %p62_p4 = pnand %p61_p3, %p55_p0 }
  0x83   :  { %v18_v5 = vpop.permute.xlu0 %17 }
  0x84   :  { %vm22_vm0 = vcmp.eq.s32.totalorder %v18_v5, %v13_v4 }
  0x85   :  { %v46_v7 = vsel %vm22_vm0, 1.0, %v80_v6 }
  0x86   :  { %28 = vst [vmem:[#allocation2] sm:$0xff] %v46_v7 }
  0x87   :  { %v21_v8 = vpop.permute.xlu0 %20 }
  0x88   :  { %vm23_vm1 = vcmp.eq.s32.totalorder %v21_v8, %v13_v4 }
  0x89   :  { %v47_v9 = vsel %vm23_vm1, 1.0, %v80_v6 }
  0x8a   :  { %29 = vst [vmem:[#allocation2 + $0x8] sm:$0xff] %v47_v9 }
  0x8b   :  { %65 = shalt.err (!%p62_p4)
}
  0x8c   :  { %s66_s14 = scalar_lea.hbm %s112_s1, 256 }
  0x8d   :  { %p67_p5 = scmp.ne.s32.totalorder %s112_s1, %s66_s14  ;;  %p70_p6 = scmp.lt.u32.totalorder %s66_s14, %s112_s1 }
  0x8f   :  { %p72_p7 = pnand %p70_p6, %p67_p5 }
  0x91   :  { %75 = shalt.err (!%p72_p7)
}
  0x92   :  { %s81_s19 = smov 128   ;;  %s82_s20 = smov 8  }
  0x93   :  { %41 = dma.vmem_to_hbm [thread:$0]  %s36_s11, 256, %s112_s1, [#allocation3], %s81_s19, %s81_s19, %s82_s20  }
  0x94   :  { %76 = dma.done.wait [#allocation3], 256  }
  0x95   :  { %77 = vsyncadd [#allocation3], 4294967040 }
  0x96   :  { %45 = vsyncpa [#allocation3], 1 }

</bundles_post_ra>
